<compile_context>
chip_gen: v7x
topology: tpu7x:2x2x1
jax: 0.10.0
libtpu: 0.0.40
codegen_flags: <defaults>
</compile_context>

<pallas_src>
import functools

import jax
import jax.numpy as jnp
from jax import lax
from jax.experimental import pallas as pl
from jax.experimental.pallas import tpu as pltpu


def _round_up(a, b):
    return -(-a // b) * b


def _round_down(a, b):
    return (a // b) * b


# ----------------------------------------------------------------------------
# Kernels
# ----------------------------------------------------------------------------
def _spoc_single_kernel(x_ref, o_ref, *, hw):
    """Full-HW path: one block covers all of H*W, so the reduction is the
    epilogue by construction.  x_ref: (tile_rows, HW), o_ref: (1, 1, tile_rows)."""
    x = x_ref[...].astype(jnp.float32)
    s = jnp.sum(x, axis=-1) * (1.0 / hw)            # (tile_rows,)
    o_ref[0] = s[None, :].astype(o_ref.dtype)       # lane-dense writeback


def _spoc_multi_kernel(x_ref, o_ref, acc_ref, *, hw, tile_hw, lane_chunks,
                       n_hw_blocks, has_ragged):
    """Split-HW path (very large H*W).

    x_ref  : (tile_rows, tile_hw) input block, tile_hw % 128 == 0
    o_ref  : (1, 1, tile_rows)    output block (resident across k)
    acc_ref: (tile_rows, 128)     f32 lane-parallel partial sums
    """
    k = pl.program_id(1)

    @pl.when(k == 0)
    def _init():
        acc_ref[...] = jnp.zeros_like(acc_ref)

    def _accumulate(mask_tail):
        # 128-lane-aligned chunk adds: pure VPU work in the hot loop; the
        # cross-lane reduce + relayout are hoisted to the epilogue below.
        last_start = (n_hw_blocks - 1) * tile_hw
        for j in range(lane_chunks):
            col0 = j * 128
            if mask_tail and last_start + col0 >= hw:
                continue                      # chunk entirely past H*W: skip
            chunk = x_ref[:, col0:col0 + 128].astype(jnp.float32)
            if mask_tail and last_start + col0 + 128 > hw:
                # Only the straddling chunk of the ragged last block is masked
                # (select, not multiply, so OOB garbage/NaN cannot leak in).
                col = last_start + col0 + lax.broadcasted_iota(
                    jnp.int32, chunk.shape, 1)
                chunk = jnp.where(col < hw, chunk, 0.0)
            acc_ref[...] += chunk

    if has_ragged:
        @pl.when(k == n_hw_blocks - 1)
        def _tail():
            _accumulate(mask_tail=True)

        @pl.when(k != n_hw_blocks - 1)
        def _body():
            _accumulate(mask_tail=False)
    else:
        _accumulate(mask_tail=False)

    @pl.when(k == n_hw_blocks - 1)
    def _finalize():
        total = jnp.sum(acc_ref[...], axis=-1)        # single cross-lane reduce
        o_ref[0] = (total * (1.0 / hw))[None, :].astype(o_ref.dtype)


# ----------------------------------------------------------------------------
# Wrapper
# ----------------------------------------------------------------------------
def _default_budgets():
    """(block_budget_bytes, vmem_limit_bytes, dual_core_hint) per generation."""
    try:
        vmem_cap = int(pltpu.get_tpu_info().vmem_capacity_bytes)
    except Exception:
        vmem_cap = None
    if vmem_cap is not None and vmem_cap >= 100 * 1024 * 1024:
        # v5e / v6e class: 128 MiB VMEM -> big blocks, generous scoped limit.
        return 16 * 1024 * 1024, 64 * 1024 * 1024, False
    if vmem_cap is not None:
        # v7x class: 64 MiB VMEM (32 MiB scoped default), 2 TensorCores/chip.
        return 12 * 1024 * 1024, 32 * 1024 * 1024, True
    # Unknown backend: conservative settings valid on every generation.
    return 8 * 1024 * 1024, 32 * 1024 * 1024, False


def spoc(x, *, block_budget_bytes=None, vmem_limit_bytes=None):
    """SPoC pooling: mean over spatial dims of an NCHW tensor -> (N, C, 1, 1)."""
    N, C, H, W = x.shape
    NC, HW = N * C, H * W
    x2d = x.reshape(NC, HW)
    itemsize = x2d.dtype.itemsize

    budget, vmem_limit, dual_core = _default_budgets()
    if block_budget_bytes is not None:
        budget = int(block_budget_bytes)
    if vmem_limit_bytes is not None:
        vmem_limit = int(vmem_limit_bytes)

    sub = max(8, 32 // itemsize)        # sublane packing: f32->8, bf16->16, int8->32
    lane = 128
    rows_needed = _round_up(NC, sub)
    hw_padded = _round_up(HW, lane)     # lane-padded VMEM width (layout-aware)

    if sub * hw_padded * itemsize <= budget:
        # ---------------- full-HW path (typical SPoC shapes) ----------------
        rows_fit = _round_down(budget // (hw_padded * itemsize), sub)
        tile_rows = int(max(sub, min(rows_fit, rows_needed)))
        # v7x: two TensorCores share the "parallel" axis -> keep >= 2 row blocks.
        if dual_core and tile_rows >= rows_needed and rows_needed >= 2 * sub:
            tile_rows = int(_round_up(-(-rows_needed // 2), sub))
        num_row_blocks = pl.cdiv(NC, tile_rows)
        grid = (num_row_blocks,)
        kernel = functools.partial(_spoc_single_kernel, hw=HW)
        in_specs = [pl.BlockSpec((tile_rows, HW), lambda i: (i, 0))]
        out_specs = pl.BlockSpec((1, 1, tile_rows), lambda i: (i, 0, 0))
        scratch_shapes = []
        dim_sem = ("parallel",)
    else:
        # ---------------- split-HW path (very large H*W) --------------------
        tile_hw = int(min(
            max(lane, _round_down(budget // (sub * itemsize), lane)),
            64 * lane,                  # bound the in-kernel lane-chunk unroll
            hw_padded))
        rows_fit = _round_down(budget // (tile_hw * itemsize), sub)
        tile_rows = int(max(sub, min(rows_fit, rows_needed)))
        if dual_core and tile_rows >= rows_needed and rows_needed >= 2 * sub:
            tile_rows = int(_round_up(-(-rows_needed // 2), sub))
        num_row_blocks = pl.cdiv(NC, tile_rows)
        n_hw_blocks = pl.cdiv(HW, tile_hw)
        grid = (num_row_blocks, n_hw_blocks)
        kernel = functools.partial(
            _spoc_multi_kernel, hw=HW, tile_hw=tile_hw,
            lane_chunks=tile_hw // lane, n_hw_blocks=n_hw_blocks,
            has_ragged=(HW % tile_hw) != 0)
        in_specs = [pl.BlockSpec((tile_rows, tile_hw), lambda i, k: (i, k))]
        out_specs = pl.BlockSpec((1, 1, tile_rows), lambda i, k: (i, 0, 0))
        scratch_shapes = [pltpu.VMEM((tile_rows, lane), jnp.float32)]
        dim_sem = ("parallel", "arbitrary")

    out = pl.pallas_call(
        kernel,
        out_shape=jax.ShapeDtypeStruct((num_row_blocks, 1, tile_rows), x.dtype),
        grid_spec=pltpu.PrefetchScalarGridSpec(
            num_scalar_prefetch=0,
            grid=grid,
            in_specs=in_specs,
            out_specs=out_specs,
            scratch_shapes=scratch_shapes,
        ),
        compiler_params=pltpu.CompilerParams(
            dimension_semantics=dim_sem,
            vmem_limit_bytes=vmem_limit,
        ),
        cost_estimate=pl.CostEstimate(
            flops=NC * HW,
            transcendentals=0,
            bytes_accessed=NC * HW * itemsize + NC * itemsize,
        ),
    )(x2d)

    # Rows past NC (ragged last row block) are garbage sums; discard them here.
    return out.reshape(num_row_blocks * tile_rows)[:NC].reshape(N, C, 1, 1)


if __name__ == "__main__":
    key = jax.random.PRNGKey(0)
    k1, k2 = jax.random.split(key)

    # Main check: typical small NCHW input, exercises the full-HW fast path.
    x = jax.random.normal(k1, (2, 4, 16, 16), dtype=jnp.float32)
    out = jax.block_until_ready(spoc(x))
    ref = jnp.mean(x, axis=(2, 3), keepdims=True)
    assert out.shape == (2, 4, 1, 1), out.shape
    assert jnp.allclose(out, ref, atol=1e-5, rtol=1e-5)

    # Also exercise the split-HW path (multi k-block accumulation + ragged
    # last-block masking) by forcing a tiny per-block budget.
    x2 = jax.random.normal(k2, (2, 4, 20, 20), dtype=jnp.float32)
    out2 = jax.block_until_ready(spoc(x2, block_budget_bytes=8 * 1024))
    ref2 = jnp.mean(x2, axis=(2, 3), keepdims=True)
    assert out2.shape == (2, 4, 1, 1), out2.shape
    assert jnp.allclose(out2, ref2, atol=1e-5, rtol=1e-5)

    print("KERNEL_OK")
</pallas_src>

<mosaic_0001>
module attributes {stable_mosaic.version = 11 : i64} {
  func.func @_spoc_single_kernel(%arg0: i32, %arg1: memref<8x256xf32, #tpu.memory_space<vmem>>, %arg2: memref<1x1x8xf32, #tpu.memory_space<vmem>>) attributes {dimension_semantics = [#tpu.dimension_semantics<parallel>], iteration_bounds = array<i64: 1>, scalar_prefetch = 0 : i64, scratch_operands = 0 : i64, tpu.core_type = #tpu.core_type<tc>, window_params = [{transform_indices = @transform_0, window_bounds = array<i64: 8, 256>}, {transform_indices = @transform_1, window_bounds = array<i64: 1, 1, 8>}]} {
    %c0 = arith.constant 0 : index
    %c0_0 = arith.constant 0 : index
    %0 = vector.load %arg1[%c0, %c0_0] : memref<8x256xf32, #tpu.memory_space<vmem>>, vector<8x256xf32>
    %cst = arith.constant dense<0.000000e+00> : vector<8xf32>
    %1 = vector.multi_reduction <add>, %0, %cst [1] : vector<8x256xf32> to vector<8xf32>
    %cst_1 = arith.constant 3.906250e-03 : f32
    %2 = vector.broadcast %cst_1 : f32 to vector<8xf32>
    %3 = arith.mulf %1, %2 : vector<8xf32>
    %4 = vector.shape_cast %3 : vector<8xf32> to vector<1x8xf32>
    %c0_2 = arith.constant 0 : index
    %c0_3 = arith.constant 0 : index
    %c0_4 = arith.constant 0 : index
    %5 = vector.load %arg2[%c0_2, %c0_3, %c0_4] : memref<1x1x8xf32, #tpu.memory_space<vmem>>, vector<1x1x8xf32>
    %6 = vector.shape_cast %5 : vector<1x1x8xf32> to vector<1x8xf32>
    %7 = vector.shape_cast %4 : vector<1x8xf32> to vector<1x1x8xf32>
    tpu.vector_store %arg2[%c0_2, %c0_3, %c0_4], %7 {strides = array<i32>} : memref<1x1x8xf32, #tpu.memory_space<vmem>>, vector<1x1x8xf32>,
    return
  }
  func.func @transform_0(%arg0: i32) -> (i32, i32) {
    %c0_i32 = arith.constant 0 : i32
    %c0_i32_0 = arith.constant 0 : i32
    return %arg0, %c0_i32 : i32, i32
  }
  func.func @transform_1(%arg0: i32) -> (i32, i32, i32) {
    %c0_i32 = arith.constant 0 : i32
    %c0_i32_0 = arith.constant 0 : i32
    %c0_i32_1 = arith.constant 0 : i32
    return %arg0, %c0_i32, %c0_i32_0 : i32, i32, i32
  }
}

</mosaic_0001>

<bundles_post_ra>
// kernel: tpu_custom_call.1
= control target key start
LH: loop header
LB: loop body
LE: loop exit
PB: predicated region body
PF: predicated region fallthrough
CT: control target
= control target key end

     0   :  { %6 = vsyncpa [#allocation3], 0  ;;  %s138_s0 = inlined_call_operand.hbm [shape: f32[8,256], index: 0, kind: input, shape index: {}]   ;;  %s139_s1 = inlined_call_operand.hbm [shape: f32[1,1,8], index: 1, kind: output, shape index: {}]  }
   0x1   :  { %7 = vsyncpa [#allocation4], 0  ;;  %s102_s6 = smov [#allocation2]   ;;  %s54_s10 = scalar_lea.hbm %s138_s0, 256 }
   0x2   :  { %s14_s7 = sshll.u32 %s102_s6, 4  ;;  %p55_p0 = scmp.ne.s32.totalorder %s138_s0, %s54_s10  ;;  %s15_s7 = int_to_ptr.vmem [resolvable:$true] %s14_s7 }
   0x3   :  { %p58_p1 = scmp.lt.u32.totalorder %s54_s10, %s138_s0 }
   0x5   :  { %p60_p2 = pnand %p58_p1, %p55_p0 }
   0x7   :  { %63 = shalt.err (!%p60_p2)
}
   0x8   :  { %s64_s15 = scalar_lea.vmem %s15_s7, 256  ;;  %p69_p4 = scmp.lt.s32.totalorder %s15_s7, %s15_s7 }
   0x9   :  { %p65_p3 = scmp.ne.s32.totalorder %s15_s7, %s64_s15  ;;  %p70_p5 = scmp.lt.s32.totalorder %s64_s15, %s64_s15 }
   0xb   :  { %p71_p6 = por %p70_p5, %p69_p4 }
   0xd   :  { %p72_p7 = pnand %p71_p6, %p65_p3 }
   0xf   :  { %75 = shalt.err (!%p72_p7)
}
  0x10   :  { %17 = dma.hbm_to_vmem [thread:$0]  %s138_s0, 256, %s15_s7, [#allocation3]  }
  0x11   :  { %98 = dma.done.wait [#allocation3], 256  }
  0x12   :  { %99 = vsyncadd [#allocation3], 4294967040  ;;  %v21_v0 = vld [vmem:[#allocation2] sm:$0xff]  ;;  %v22_v1 = vld [vmem:[#allocation2 + $0x8] sm:$0xff]  ;;  %v28_v3 = vlaneseq  ;;  %s103_s18 = smov [#allocation5]   ;;  %vm35_vm0 = vcmask 57344  }
  0x13   :  { %v23_v2 = vadd.f32 %v22_v1, %v21_v0  ;;  %s43_s19 = sshll.u32 %s103_s18, 4  ;;  %s44_s19 = int_to_ptr.vmem [resolvable:$true] %s43_s19 }
  0x14   :  { %v29_v4 = vand.u32 127, %v28_v3  ;;  %v31_v5 = vshrl.u32 %v28_v3, 7  ;;  %s76_s20 = scalar_lea.vmem %s44_s19, 16  ;;  %s80_s0 = scalar_lea.vmem %s44_s19, 32 }
  0x15   :  { %24 = vadd.xlane.f32.xlu0 %v23_v2  ;;  %p77_p8 = scmp.ne.s32.totalorder %s44_s19, %s76_s20  ;;  %p81_p9 = scmp.lt.s32.totalorder %s44_s19, %s44_s19 }
  0x16   :  { %v32_v6 = vsub.s32 %v29_v4, %v31_v5  ;;  %p82_p10 = scmp.lt.s32.totalorder %s80_s0, %s76_s20 }
  0x18   :  { %p83_p11 = por %p82_p10, %p81_p9 }
  0x1a   :  { %p84_p12 = pnand %p83_p11, %p77_p8 }
  0xa2   :  { %v25_v7 = vpop.xlane.xlu0 %24 }
  0xa3   :  { %v26_v8 = vmul.f32 0.00390625, %v25_v7 }
  0xa5   :  { %v33_v9 = vrot.slane %v26_v8, %v32_v6 }
  0xa7   :  { %36 = vst.msk [vmem:[#allocation5] sm:$0x1] %vm35_vm0, %v33_v9 }
  0xa8   :  { %87 = shalt.err (!%p84_p12)
}
  0xa9   :  { %s88_s23 = scalar_lea.hbm %s139_s1, 16 }
  0xaa   :  { %p89_p13 = scmp.ne.s32.totalorder %s139_s1, %s88_s23  ;;  %p92_p0 = scmp.lt.u32.totalorder %s88_s23, %s139_s1 }
  0xac   :  { %p94_p1 = pnand %p92_p0, %p89_p13 }
  0xae   :  { %97 = shalt.err (!%p94_p1)
}
  0xaf   :  { %46 = dma.vmem_to_hbm [thread:$0]  %s44_s19, 16, %s139_s1, [#allocation4]  }
  0xb0   :  { %100 = dma.done.wait [#allocation4], 16  }
  0xb1   :  { %101 = vsyncadd [#allocation4], 4294967280 }
  0xb2   :  { %50 = vsyncpa [#allocation3], 1 }
  0xb3   :  { %51 = vsyncpa [#allocation4], 1 }

</bundles_post_ra>
